<compile_context>
chip_gen: v6e
topology: v6e:2x2x1
jax: 0.10.0
libtpu: 0.0.40
codegen_flags: <defaults>
</compile_context>

<pallas_src>
import functools

import jax
import jax.numpy as jnp
from jax.experimental import pallas as pl
from jax.experimental.pallas import tpu as pltpu

EPS = 1e-5


def _round_up(x, m):
    return ((x + m - 1) // m) * m


def _slab_layout(din, n_actions, fc1, fc2, fc3):
    """Row offsets of each weight block inside the packed bf16 slab.

    All block starts are multiples of 16 rows (bf16 sublane tile) so every
    in-kernel ref slice is tile-aligned.
    """
    kin = din + n_actions          # fused [state | action] input width
    kmid = fc1 + fc3               # fused [h1 | ha] activation width
    r1 = _round_up(kin, 16)        # [W2; 0]    (kmid rows, fc2 lanes)
    r2 = r1 + _round_up(kmid, 16)  # W3_state   (fc2 rows,  fc3 lanes)
    r3 = r2 + _round_up(fc2, 16)   # [0; W3a]   (kmid rows, fc3 lanes)
    rows = r3 + _round_up(kmid, 16)
    width = max(kmid, fc2, fc3)
    return r1, r2, r3, rows, width


def _bn_relu(x, gamma, beta):
    """Training-mode BatchNorm1d (biased var) + affine + ReLU, single pass.

    sum(x) and sum(x*x) are independent reductions; normalize+affine is folded
    to one multiply-add.  Variance is clamped at 0 so cancellation in
    E[x^2]-mean^2 can never push rsqrt into NaN (review #9).
    """
    inv_n = 1.0 / x.shape[0]
    mean = jnp.sum(x, axis=0, keepdims=True) * inv_n
    ex2 = jnp.sum(x * x, axis=0, keepdims=True) * inv_n
    var = jnp.maximum(ex2 - mean * mean, 0.0)
    scale = gamma * jax.lax.rsqrt(var + EPS)
    shift = beta - mean * scale
    return jnp.maximum(x * scale + shift, 0.0)


def critic_kernel(state_ref, action_ref, wts_ref, vec_ref, q_ref,
                  *, din, n_actions, fc1, fc2, fc3):
    kin = din + n_actions
    kmid = fc1 + fc3
    r1, r2, r3, _, _ = _slab_layout(din, n_actions, fc1, fc2, fc3)

    s = state_ref[...].astype(jnp.float32)      # (B, din)
    a = action_ref[...].astype(jnp.float32)     # (B, n_actions) — raw, no pad

    # --- static, tile-aligned slices of the packed bf16 weight slab ---------
    win_s = wts_ref[0:din, 0:kmid]              # [W1 | 0]   (din, kmid)
    win_a = wts_ref[din:kin, 0:kmid]            # [0  | Wa]  (n_actions, kmid)
    w2p = wts_ref[r1:r1 + kmid, 0:fc2]          # [W2; 0]    (kmid, fc2)
    w3s = wts_ref[r2:r2 + fc2, 0:fc3]           # W3_state   (fc2, fc3)
    w3ap = wts_ref[r3:r3 + kmid, 0:fc3]         # [0; W3a]   (kmid, fc3)

    # --- per-feature vectors (f32): one small slab, value-sliced ------------
    vec = vec_ref[...]                          # (8, vec_w)
    g1a, b1a = vec[0:1, 0:kmid], vec[1:2, 0:kmid]   # [g1|ga], [be1|bea]
    g2, b2 = vec[2:3, 0:fc2], vec[3:4, 0:fc2]
    g3, b3 = vec[4:5, 0:fc3], vec[5:6, 0:fc3]
    wq, bq = vec[6:7, 0:fc3], vec[7:8, 0:1]

    # Layer 1: fc1 + action_fc against the block-diagonal weight, ONE wide BN.
    # (Pre-BN linear biases dropped: exactly cancelled by training-mode BN.)
    h_in = (jnp.dot(s.astype(jnp.bfloat16), win_s,
                    preferred_element_type=jnp.float32)
            + jnp.dot(a.astype(jnp.bfloat16), win_a,
                      preferred_element_type=jnp.float32))   # (B, kmid)
    h1a = _bn_relu(h_in, g1a, b1a)              # lanes [0:fc1]=h1, [fc1:]=ha

    # Layer 2: zero rows in [W2; 0] make the ha lanes inert, so no unaligned
    # lane slice of h1a is needed.
    h2 = _bn_relu(jnp.dot(h1a.astype(jnp.bfloat16), w2p,
                          preferred_element_type=jnp.float32), g2, b2)

    # Layer 3: concat([h2, ha]) @ W3  ==  h2 @ W3s + h1a @ [0; W3a]
    h3 = _bn_relu(
        jnp.dot(h2.astype(jnp.bfloat16), w3s, preferred_element_type=jnp.float32)
        + jnp.dot(h1a.astype(jnp.bfloat16), w3ap,
                  preferred_element_type=jnp.float32),
        g3, b3)

    # q head: N=1 output -> keep it off the MXU (VPU multiply + lane reduce).
    q_ref[...] = jnp.sum(h3 * wq, axis=-1, keepdims=True) + bq


def make_critic_forward(din, n_actions, fc1, fc2, fc3):
    """Builds a jitted forward(state, action, packed_params) -> (B, 1)."""
    kernel = functools.partial(
        critic_kernel, din=din, n_actions=n_actions, fc1=fc1, fc2=fc2, fc3=fc3)
    kin, kmid = din + n_actions, fc1 + fc3

    @jax.jit
    def forward(state, action, packed):
        if state.ndim == 1:
            state = state[None, :]
        if action.ndim == 1:
            action = action[None, :]
        # Force a common f32 elementwise dtype (bf16/f32 mixes never silently
        # downcast one operand).
        state = state.astype(jnp.float32)
        action = action.astype(jnp.float32)
        B = state.shape[0]

        operands = (state, action, packed["wts"], packed["vec"])
        vmem = pl.BlockSpec(memory_space=pltpu.MemorySpace.VMEM)

        flops = 2 * B * (kin * kmid + kmid * fc2 + fc2 * fc3 + kmid * fc3 + fc3)
        bytes_accessed = int((state.size + action.size + packed["vec"].size + B) * 4
                             + packed["wts"].size * 2)
        # Scoped-VMEM limit sized from B (live f32 activations + temps per row)
        # with headroom; capped at 64 MiB so it stays valid on v7x.
        vmem_limit = int(min(64 << 20, max(16 << 20, B * 6144 + (2 << 20))))

        return pl.pallas_call(
            kernel,
            out_shape=jax.ShapeDtypeStruct((B, 1), jnp.float32),
            in_specs=[vmem] * len(operands),
            out_specs=vmem,
            compiler_params=pltpu.CompilerParams(vmem_limit_bytes=vmem_limit),
            cost_estimate=pl.CostEstimate(
                flops=flops,
                transcendentals=kmid + fc2 + fc3,   # one rsqrt per BN feature
                bytes_accessed=bytes_accessed,
            ),
        )(*operands)

    return forward


# --------------------------- parameter handling -----------------------------

def _xavier_uniform(key, fan_in, fan_out):
    bound = (6.0 / (fan_in + fan_out)) ** 0.5
    return jax.random.uniform(
        key, (fan_in, fan_out), jnp.float32, minval=-bound, maxval=bound)


def _bias(key, fan_in, fan_out):
    bound = 1.0 / (fan_in ** 0.5)
    return jax.random.uniform(
        key, (1, fan_out), jnp.float32, minval=-bound, maxval=bound)


def init_params(key, input_dims, n_actions, fc1, fc2, fc3):
    keys = jax.random.split(key, 10)
    p = {}
    p["w1"] = _xavier_uniform(keys[0], input_dims, fc1)
    p["b1"] = _bias(keys[1], input_dims, fc1)
    p["g1"] = jnp.ones((1, fc1), jnp.float32)
    p["be1"] = jnp.zeros((1, fc1), jnp.float32)
    p["w2"] = _xavier_uniform(keys[2], fc1, fc2)
    p["b2"] = _bias(keys[3], fc1, fc2)
    p["g2"] = jnp.ones((1, fc2), jnp.float32)
    p["be2"] = jnp.zeros((1, fc2), jnp.float32)
    p["wa"] = _xavier_uniform(keys[4], n_actions, fc3)
    p["ba"] = _bias(keys[5], n_actions, fc3)
    p["ga"] = jnp.ones((1, fc3), jnp.float32)
    p["bea"] = jnp.zeros((1, fc3), jnp.float32)
    w3_full = _xavier_uniform(keys[6], fc2 + fc3, fc3)
    p["w3s"] = w3_full[:fc2, :]
    p["w3a"] = w3_full[fc2:, :]
    p["b3"] = _bias(keys[7], fc2 + fc3, fc3)
    p["g3"] = jnp.ones((1, fc3), jnp.float32)
    p["be3"] = jnp.zeros((1, fc3), jnp.float32)
    p["wq"] = _xavier_uniform(keys[8], fc3, 1)
    p["bq"] = _bias(keys[9], fc3, 1)
    return p


def pack_params(p, *, din, n_actions, fc1, fc2, fc3):
    """Packs kernel-visible params into 2 slabs (bf16 weights + f32 vectors).

    Pre-BN linear biases are intentionally not packed: with training-mode BN
    they are exactly cancelled by the mean subtraction.
    """
    kin = din + n_actions
    kmid = fc1 + fc3
    r1, r2, r3, rows, width = _slab_layout(din, n_actions, fc1, fc2, fc3)

    wts = jnp.zeros((rows, width), jnp.float32)
    # block-diagonal input weight [[W1, 0], [0, Wa]]
    wts = wts.at[0:din, 0:fc1].set(p["w1"])
    wts = wts.at[din:kin, fc1:kmid].set(p["wa"])
    # [W2; 0] — zero rows keep the ha lanes inert in layer 2
    wts = wts.at[r1:r1 + fc1, 0:fc2].set(p["w2"])
    # W3_state
    wts = wts.at[r2:r2 + fc2, 0:fc3].set(p["w3s"])
    # [0; W3a]
    wts = wts.at[r3 + fc1:r3 + kmid, 0:fc3].set(p["w3a"])
    wts = wts.astype(jnp.bfloat16)      # bf16 MXU inputs (review #2)

    vec_w = max(kmid, fc2)
    vec = jnp.zeros((8, vec_w), jnp.float32)
    vec = vec.at[0, 0:fc1].set(p["g1"].reshape(-1))
    vec = vec.at[0, fc1:kmid].set(p["ga"].reshape(-1))
    vec = vec.at[1, 0:fc1].set(p["be1"].reshape(-1))
    vec = vec.at[1, fc1:kmid].set(p["bea"].reshape(-1))
    vec = vec.at[2, 0:fc2].set(p["g2"].reshape(-1))
    vec = vec.at[3, 0:fc2].set(p["be2"].reshape(-1))
    vec = vec.at[4, 0:fc3].set(p["g3"].reshape(-1))
    vec = vec.at[5, 0:fc3].set(p["be3"].reshape(-1))
    vec = vec.at[6, 0:fc3].set(p["wq"].reshape(-1))
    vec = vec.at[7, 0].set(p["bq"].reshape(-1)[0])

    return {"wts": wts, "vec": vec}


# ------------------------------- reference ----------------------------------

def critic_reference(state, action, p, *, matmul_dtype=jnp.float32):
    """Pure-JAX reference of the PyTorch forward (training-mode BN, with the
    pre-BN linear biases exactly as in the nn.Module).  `matmul_dtype=bf16`
    mirrors the kernel's MXU input precision for a tight comparison."""
    def mm(x, w):
        return jnp.dot(x.astype(matmul_dtype), w.astype(matmul_dtype),
                       preferred_element_type=jnp.float32)

    def bn_relu(x, g, b):
        m = jnp.mean(x, axis=0, keepdims=True)
        v = jnp.mean((x - m) ** 2, axis=0, keepdims=True)
        return jnp.maximum((x - m) / jnp.sqrt(v + EPS) * g + b, 0.0)

    sv = bn_relu(mm(state, p["w1"]) + p["b1"], p["g1"], p["be1"])
    sv = bn_relu(mm(sv, p["w2"]) + p["b2"], p["g2"], p["be2"])
    av = bn_relu(mm(action, p["wa"]) + p["ba"], p["ga"], p["bea"])
    sav = jnp.concatenate([sv, av], axis=1)
    w3 = jnp.concatenate([p["w3s"], p["w3a"]], axis=0)
    sav = bn_relu(mm(sav, w3) + p["b3"], p["g3"], p["be3"])
    return sav @ p["wq"] + p["bq"]


if __name__ == "__main__":
    # Config-implied sizes (small): num_houses=2, state_dim_per_house=8,
    # action_dim_per_house=3 -> input_dims=16, n_actions=6.
    num_houses = 2
    state_dim_per_house = 8
    action_dim_per_house = 3
    input_dims = num_houses * state_dim_per_house      # 16
    n_actions = num_houses * action_dim_per_house      # 6
    fc1_dims, fc2_dims, fc3_dims = 64, 64, 32
    batch = 8

    root = jax.random.PRNGKey(0)
    k_params, k_state, k_action = jax.random.split(root, 3)

    params = init_params(k_params, input_dims, n_actions,
                         fc1_dims, fc2_dims, fc3_dims)
    packed = pack_params(params, din=input_dims, n_actions=n_actions,
                         fc1=fc1_dims, fc2=fc2_dims, fc3=fc3_dims)
    packed = jax.tree_util.tree_map(jax.block_until_ready, packed)

    state = jax.random.normal(k_state, (batch, input_dims), jnp.float32)
    action = jax.random.normal(k_action, (batch, n_actions), jnp.float32)

    critic_forward = make_critic_forward(input_dims, n_actions,
                                         fc1_dims, fc2_dims, fc3_dims)

    q = jax.block_until_ready(critic_forward(state, action, packed))
    assert q.shape == (batch, 1)

    # Tight check vs a reference that mirrors the kernel's bf16 MXU inputs
    # (remaining differences: dropped BN-cancelled biases, single-pass BN,
    # summation order — all f32 rounding-level).
    q_ref_bf16 = critic_reference(state, action, params,
                                  matmul_dtype=jnp.bfloat16)
    assert jnp.allclose(q, q_ref_bf16, atol=5e-3, rtol=5e-3), (q, q_ref_bf16)

    # Loose sanity check vs the full-f32, PyTorch-faithful reference: the gap
    # is bf16 rounding of matmul inputs, amplified by three BN layers.
    q_ref_f32 = critic_reference(state, action, params,
                                 matmul_dtype=jnp.float32)
    assert jnp.allclose(q, q_ref_f32, atol=0.2, rtol=0.05), (q, q_ref_f32)

    print("KERNEL_OK")
</pallas_src>

<mosaic_0001>
module attributes {stable_mosaic.version = 11 : i64} {
  func.func @critic_kernel(%arg0: memref<8x16xf32, #tpu.memory_space<vmem>>, %arg1: memref<8x6xf32, #tpu.memory_space<vmem>>, %arg2: memref<288x96xbf16, #tpu.memory_space<vmem>>, %arg3: memref<8x96xf32, #tpu.memory_space<vmem>>, %arg4: memref<8x1xf32, #tpu.memory_space<vmem>>) attributes {dimension_semantics = [], scalar_prefetch = 0 : i64, scratch_operands = 0 : i64, tpu.core_type = #tpu.core_type<tc>} {
    %c0 = arith.constant 0 : index
    %c0_0 = arith.constant 0 : index
    %0 = vector.load %arg0[%c0, %c0_0] : memref<8x16xf32, #tpu.memory_space<vmem>>, vector<8x16xf32>
    %c0_1 = arith.constant 0 : index
    %c0_2 = arith.constant 0 : index
    %1 = vector.load %arg1[%c0_1, %c0_2] : memref<8x6xf32, #tpu.memory_space<vmem>>, vector<8x6xf32>
    %c0_3 = arith.constant 0 : index
    %c0_4 = arith.constant 0 : index
    %2 = vector.load %arg2[%c0_3, %c0_4] : memref<288x96xbf16, #tpu.memory_space<vmem>>, vector<16x96xbf16>
    %c16 = arith.constant 16 : index
    %c0_5 = arith.constant 0 : index
    %3 = vector.load %arg2[%c16, %c0_5] : memref<288x96xbf16, #tpu.memory_space<vmem>>, vector<6x96xbf16>
    %c32 = arith.constant 32 : index
    %c0_6 = arith.constant 0 : index
    %4 = vector.load %arg2[%c32, %c0_6] : memref<288x96xbf16, #tpu.memory_space<vmem>>, vector<96x64xbf16>
    %c128 = arith.constant 128 : index
    %c0_7 = arith.constant 0 : index
    %5 = vector.load %arg2[%c128, %c0_7] : memref<288x96xbf16, #tpu.memory_space<vmem>>, vector<64x32xbf16>
    %c192 = arith.constant 192 : index
    %c0_8 = arith.constant 0 : index
    %6 = vector.load %arg2[%c192, %c0_8] : memref<288x96xbf16, #tpu.memory_space<vmem>>, vector<96x32xbf16>
    %c0_9 = arith.constant 0 : index
    %c0_10 = arith.constant 0 : index
    %7 = vector.load %arg3[%c0_9, %c0_10] : memref<8x96xf32, #tpu.memory_space<vmem>>, vector<8x96xf32>
    %8 = vector.extract_strided_slice %7 {offsets = [0, 0], sizes = [1, 96], strides = [1, 1]} : vector<8x96xf32> to vector<1x96xf32>
    %9 = vector.extract_strided_slice %7 {offsets = [1, 0], sizes = [1, 96], strides = [1, 1]} : vector<8x96xf32> to vector<1x96xf32>
    %10 = vector.extract_strided_slice %7 {offsets = [2, 0], sizes = [1, 64], strides = [1, 1]} : vector<8x96xf32> to vector<1x64xf32>
    %11 = vector.extract_strided_slice %7 {offsets = [3, 0], sizes = [1, 64], strides = [1, 1]} : vector<8x96xf32> to vector<1x64xf32>
    %12 = vector.extract_strided_slice %7 {offsets = [4, 0], sizes = [1, 32], strides = [1, 1]} : vector<8x96xf32> to vector<1x32xf32>
    %13 = vector.extract_strided_slice %7 {offsets = [5, 0], sizes = [1, 32], strides = [1, 1]} : vector<8x96xf32> to vector<1x32xf32>
    %14 = vector.extract_strided_slice %7 {offsets = [6, 0], sizes = [1, 32], strides = [1, 1]} : vector<8x96xf32> to vector<1x32xf32>
    %15 = vector.extract_strided_slice %7 {offsets = [7, 0], sizes = [1, 1], strides = [1, 1]} : vector<8x96xf32> to vector<1x1xf32>
    %16 = arith.truncf %0 : vector<8x16xf32> to vector<8x16xbf16>
    %cst = arith.constant dense<0.000000e+00> : vector<8x96xf32>
    %17 = tpu.matmul %16, %2, %cst {dimension_numbers = #tpu.dot_dimension_numbers<[1], [0], [0], [1], [0, 0, 1, 1], [], []>} : vector<8x16xbf16>, vector<16x96xbf16>, vector<8x96xf32> -> vector<8x96xf32>
    %18 = arith.truncf %1 : vector<8x6xf32> to vector<8x6xbf16>
    %cst_11 = arith.constant dense<0.000000e+00> : vector<8x96xf32>
    %19 = tpu.matmul %18, %3, %cst_11 {dimension_numbers = #tpu.dot_dimension_numbers<[1], [0], [0], [1], [0, 0, 1, 1], [], []>} : vector<8x6xbf16>, vector<6x96xbf16>, vector<8x96xf32> -> vector<8x96xf32>
    %20 = arith.addf %17, %19 : vector<8x96xf32>
    %cst_12 = arith.constant dense<0.000000e+00> : vector<96xf32>
    %21 = vector.multi_reduction <add>, %20, %cst_12 [0] : vector<8x96xf32> to vector<96xf32>
    %22 = vector.shape_cast %21 : vector<96xf32> to vector<1x96xf32>
    %cst_13 = arith.constant 1.250000e-01 : f32
    %23 = vector.broadcast %cst_13 : f32 to vector<1x96xf32>
    %24 = arith.mulf %22, %23 : vector<1x96xf32>
    %25 = arith.mulf %20, %20 : vector<8x96xf32>
    %cst_14 = arith.constant dense<0.000000e+00> : vector<96xf32>
    %26 = vector.multi_reduction <add>, %25, %cst_14 [0] : vector<8x96xf32> to vector<96xf32>
    %27 = vector.shape_cast %26 : vector<96xf32> to vector<1x96xf32>
    %cst_15 = arith.constant 1.250000e-01 : f32
    %28 = vector.broadcast %cst_15 : f32 to vector<1x96xf32>
    %29 = arith.mulf %27, %28 : vector<1x96xf32>
    %30 = arith.mulf %24, %24 : vector<1x96xf32>
    %31 = arith.subf %29, %30 : vector<1x96xf32>
    %cst_16 = arith.constant 0.000000e+00 : f32
    %32 = vector.broadcast %cst_16 : f32 to vector<1x96xf32>
    %33 = arith.maximumf %31, %32 : vector<1x96xf32>
    %cst_17 = arith.constant 9.99999974E-6 : f32
    %34 = vector.broadcast %cst_17 : f32 to vector<1x96xf32>
    %35 = arith.addf %33, %34 : vector<1x96xf32>
    %36 = math.rsqrt %35 : vector<1x96xf32>
    %37 = arith.mulf %8, %36 : vector<1x96xf32>
    %38 = arith.mulf %24, %37 : vector<1x96xf32>
    %39 = arith.subf %9, %38 : vector<1x96xf32>
    %40 = vector.broadcast %37 : vector<1x96xf32> to vector<8x96xf32>
    %41 = arith.mulf %20, %40 : vector<8x96xf32>
    %42 = vector.broadcast %39 : vector<1x96xf32> to vector<8x96xf32>
    %43 = arith.addf %41, %42 : vector<8x96xf32>
    %cst_18 = arith.constant 0.000000e+00 : f32
    %44 = vector.broadcast %cst_18 : f32 to vector<8x96xf32>
    %45 = arith.maximumf %43, %44 : vector<8x96xf32>
    %46 = arith.truncf %45 : vector<8x96xf32> to vector<8x96xbf16>
    %cst_19 = arith.constant dense<0.000000e+00> : vector<8x64xf32>
    %47 = tpu.matmul %46, %4, %cst_19 {dimension_numbers = #tpu.dot_dimension_numbers<[1], [0], [0], [1], [0, 0, 1, 1], [], []>} : vector<8x96xbf16>, vector<96x64xbf16>, vector<8x64xf32> -> vector<8x64xf32>
    %cst_20 = arith.constant dense<0.000000e+00> : vector<64xf32>
    %48 = vector.multi_reduction <add>, %47, %cst_20 [0] : vector<8x64xf32> to vector<64xf32>
    %49 = vector.shape_cast %48 : vector<64xf32> to vector<1x64xf32>
    %cst_21 = arith.constant 1.250000e-01 : f32
    %50 = vector.broadcast %cst_21 : f32 to vector<1x64xf32>
    %51 = arith.mulf %49, %50 : vector<1x64xf32>
    %52 = arith.mulf %47, %47 : vector<8x64xf32>
    %cst_22 = arith.constant dense<0.000000e+00> : vector<64xf32>
    %53 = vector.multi_reduction <add>, %52, %cst_22 [0] : vector<8x64xf32> to vector<64xf32>
    %54 = vector.shape_cast %53 : vector<64xf32> to vector<1x64xf32>
    %cst_23 = arith.constant 1.250000e-01 : f32
    %55 = vector.broadcast %cst_23 : f32 to vector<1x64xf32>
    %56 = arith.mulf %54, %55 : vector<1x64xf32>
    %57 = arith.mulf %51, %51 : vector<1x64xf32>
    %58 = arith.subf %56, %57 : vector<1x64xf32>
    %cst_24 = arith.constant 0.000000e+00 : f32
    %59 = vector.broadcast %cst_24 : f32 to vector<1x64xf32>
    %60 = arith.maximumf %58, %59 : vector<1x64xf32>
    %cst_25 = arith.constant 9.99999974E-6 : f32
    %61 = vector.broadcast %cst_25 : f32 to vector<1x64xf32>
    %62 = arith.addf %60, %61 : vector<1x64xf32>
    %63 = math.rsqrt %62 : vector<1x64xf32>
    %64 = arith.mulf %10, %63 : vector<1x64xf32>
    %65 = arith.mulf %51, %64 : vector<1x64xf32>
    %66 = arith.subf %11, %65 : vector<1x64xf32>
    %67 = vector.broadcast %64 : vector<1x64xf32> to vector<8x64xf32>
    %68 = arith.mulf %47, %67 : vector<8x64xf32>
    %69 = vector.broadcast %66 : vector<1x64xf32> to vector<8x64xf32>
    %70 = arith.addf %68, %69 : vector<8x64xf32>
    %cst_26 = arith.constant 0.000000e+00 : f32
    %71 = vector.broadcast %cst_26 : f32 to vector<8x64xf32>
    %72 = arith.maximumf %70, %71 : vector<8x64xf32>
    %73 = arith.truncf %72 : vector<8x64xf32> to vector<8x64xbf16>
    %cst_27 = arith.constant dense<0.000000e+00> : vector<8x32xf32>
    %74 = tpu.matmul %73, %5, %cst_27 {dimension_numbers = #tpu.dot_dimension_numbers<[1], [0], [0], [1], [0, 0, 1, 1], [], []>} : vector<8x64xbf16>, vector<64x32xbf16>, vector<8x32xf32> -> vector<8x32xf32>
    %75 = arith.truncf %45 : vector<8x96xf32> to vector<8x96xbf16>
    %cst_28 = arith.constant dense<0.000000e+00> : vector<8x32xf32>
    %76 = tpu.matmul %75, %6, %cst_28 {dimension_numbers = #tpu.dot_dimension_numbers<[1], [0], [0], [1], [0, 0, 1, 1], [], []>} : vector<8x96xbf16>, vector<96x32xbf16>, vector<8x32xf32> -> vector<8x32xf32>
    %77 = arith.addf %74, %76 : vector<8x32xf32>
    %cst_29 = arith.constant dense<0.000000e+00> : vector<32xf32>
    %78 = vector.multi_reduction <add>, %77, %cst_29 [0] : vector<8x32xf32> to vector<32xf32>
    %79 = vector.shape_cast %78 : vector<32xf32> to vector<1x32xf32>
    %cst_30 = arith.constant 1.250000e-01 : f32
    %80 = vector.broadcast %cst_30 : f32 to vector<1x32xf32>
    %81 = arith.mulf %79, %80 : vector<1x32xf32>
    %82 = arith.mulf %77, %77 : vector<8x32xf32>
    %cst_31 = arith.constant dense<0.000000e+00> : vector<32xf32>
    %83 = vector.multi_reduction <add>, %82, %cst_31 [0] : vector<8x32xf32> to vector<32xf32>
    %84 = vector.shape_cast %83 : vector<32xf32> to vector<1x32xf32>
    %cst_32 = arith.constant 1.250000e-01 : f32
    %85 = vector.broadcast %cst_32 : f32 to vector<1x32xf32>
    %86 = arith.mulf %84, %85 : vector<1x32xf32>
    %87 = arith.mulf %81, %81 : vector<1x32xf32>
    %88 = arith.subf %86, %87 : vector<1x32xf32>
    %cst_33 = arith.constant 0.000000e+00 : f32
    %89 = vector.broadcast %cst_33 : f32 to vector<1x32xf32>
    %90 = arith.maximumf %88, %89 : vector<1x32xf32>
    %cst_34 = arith.constant 9.99999974E-6 : f32
    %91 = vector.broadcast %cst_34 : f32 to vector<1x32xf32>
    %92 = arith.addf %90, %91 : vector<1x32xf32>
    %93 = math.rsqrt %92 : vector<1x32xf32>
    %94 = arith.mulf %12, %93 : vector<1x32xf32>
    %95 = arith.mulf %81, %94 : vector<1x32xf32>
    %96 = arith.subf %13, %95 : vector<1x32xf32>
    %97 = vector.broadcast %94 : vector<1x32xf32> to vector<8x32xf32>
    %98 = arith.mulf %77, %97 : vector<8x32xf32>
    %99 = vector.broadcast %96 : vector<1x32xf32> to vector<8x32xf32>
    %100 = arith.addf %98, %99 : vector<8x32xf32>
    %cst_35 = arith.constant 0.000000e+00 : f32
    %101 = vector.broadcast %cst_35 : f32 to vector<8x32xf32>
    %102 = arith.maximumf %100, %101 : vector<8x32xf32>
    %103 = vector.broadcast %14 : vector<1x32xf32> to vector<8x32xf32>
    %104 = arith.mulf %102, %103 : vector<8x32xf32>
    %cst_36 = arith.constant dense<0.000000e+00> : vector<8xf32>
    %105 = vector.multi_reduction <add>, %104, %cst_36 [1] : vector<8x32xf32> to vector<8xf32>
    %106 = vector.shape_cast %105 : vector<8xf32> to vector<8x1xf32>
    %107 = vector.broadcast %15 : vector<1x1xf32> to vector<8x1xf32>
    %108 = arith.addf %106, %107 : vector<8x1xf32>
    %c0_37 = arith.constant 0 : index
    %c0_38 = arith.constant 0 : index
    %109 = vector.load %arg4[%c0_37, %c0_38] : memref<8x1xf32, #tpu.memory_space<vmem>>, vector<8x1xf32>
    tpu.vector_store %arg4[%c0_37, %c0_38], %108 {strides = array<i32>} : memref<8x1xf32, #tpu.memory_space<vmem>>, vector<8x1xf32>,
    return
  }
}

</mosaic_0001>

<bundles_post_ra>
// kernel: forward.1
= control target key start
LH: loop header
LB: loop body
LE: loop exit
PB: predicated region body
PF: predicated region fallthrough
CT: control target
= control target key end

     0   :  { %9 = vsyncpa [#allocation3], 0  ;;  %s895_s0 = inlined_call_operand.hbm [shape: f32[8,16], index: 0, kind: input, shape index: {}]   ;;  %s896_s1 = inlined_call_operand.hbm [shape: f32[8,6], index: 1, kind: input, shape index: {}]   ;;  %s897_s2 = inlined_call_operand.hbm [shape: bf16[288,96], index: 2, kind: input, shape index: {}]   ;;  %s898_s3 = inlined_call_operand.hbm [shape: f32[8,96], index: 3, kind: input, shape index: {}]   ;;  %s899_s4 = inlined_call_operand.vmem [shape: f32[8,1], index: 4, kind: output, shape index: {}]  }
   0x1   :  { %10 = vsyncpa [#allocation5], 0 }
   0x2   :  { %11 = vsyncpa [#allocation8], 0  ;;  %s789_s15 = smov [#allocation4]   ;;  %s790_s17 = smov [#allocation2]  }
   0x3   :  { %s28_s16 = sshll.u32 %s789_s15, 4  ;;  %s18_s18 = sshll.u32 %s790_s17, 4  ;;  %s29_s16 = int_to_ptr.vmem [resolvable:$true] %s28_s16  ;;  %s19_s18 = int_to_ptr.vmem [resolvable:$true] %s18_s18 }
   0x4   :  { %s711_s19 = scalar_lea.vmem %s29_s16, 128  ;;  %p716_p1 = scmp.lt.s32.totalorder %s29_s16, %s29_s16 }
   0x5   :  { %p712_p0 = scmp.ne.s32.totalorder %s29_s16, %s711_s19  ;;  %p717_p2 = scmp.lt.s32.totalorder %s711_s19, %s711_s19 }
   0x7   :  { %p718_p3 = por %p717_p2, %p716_p1 }
   0x9   :  { %p719_p4 = pnand %p718_p3, %p712_p0 }
   0xb   :  { %722 = shalt.err (!%p719_p4)
}
   0xc   :  { %31 = dma.hbm_to_vmem [thread:$0]  %s896_s1, 128, %s29_s16, [#allocation5]  }
   0xd   :  { %s731_s22 = scalar_lea.vmem %s19_s18, 128  ;;  %p736_p6 = scmp.lt.s32.totalorder %s19_s18, %s19_s18 }
   0xe   :  { %p732_p5 = scmp.ne.s32.totalorder %s19_s18, %s731_s22  ;;  %p737_p7 = scmp.lt.s32.totalorder %s731_s22, %s731_s22 }
  0x10   :  { %p738_p8 = por %p737_p7, %p736_p6 }
  0x12   :  { %p739_p9 = pnand %p738_p8, %p732_p5 }
  0x14   :  { %742 = shalt.err (!%p739_p9)
}
  0x15   :  { %21 = dma.hbm_to_vmem [thread:$0]  %s895_s0, 128, %s19_s18, [#allocation3]  }
  0x16   :  { %s791_s25 = smov [#allocation6]  }
  0x17   :  { %s37_s26 = sshll.u32 %s791_s25, 4  ;;  %s38_s26 = int_to_ptr.vmem [resolvable:$true] %s37_s26 }
  0x18   :  { %s751_s27 = scalar_lea.vmem %s38_s26, 2304  ;;  %p756_p11 = scmp.lt.s32.totalorder %s38_s26, %s38_s26 }
  0x19   :  { %p752_p10 = scmp.ne.s32.totalorder %s38_s26, %s751_s27  ;;  %p757_p12 = scmp.lt.s32.totalorder %s751_s27, %s751_s27 }
  0x1b   :  { %p758_p13 = por %p757_p12, %p756_p11 }
  0x1d   :  { %p759_p0 = pnand %p758_p13, %p752_p10 }
  0x1f   :  { %762 = shalt.err (!%p759_p0)
}
  0x20   :  { %s792_s1 = smov 64   ;;  %s793_s28 = smov 4  }
  0x21   :  { %43 = dma.hbm_to_vmem [thread:$0]  %s897_s2, 2304, %s38_s26, [#allocation5], %s792_s1, %s792_s1, %s793_s28  }
  0x22   :  { %s794_s5 = smov [#allocation7]  }
  0x23   :  { %s50_s6 = sshll.u32 %s794_s5, 4  ;;  %s51_s6 = int_to_ptr.vmem [resolvable:$true] %s50_s6 }
  0x24   :  { %s771_s0 = scalar_lea.vmem %s51_s6, 128  ;;  %p776_p2 = scmp.lt.s32.totalorder %s51_s6, %s51_s6 }
  0x25   :  { %p772_p1 = scmp.ne.s32.totalorder %s51_s6, %s771_s0  ;;  %p777_p3 = scmp.lt.s32.totalorder %s771_s0, %s771_s0 }
  0x27   :  { %p778_p4 = por %p777_p3, %p776_p2 }
  0x29   :  { %p779_p5 = pnand %p778_p4, %p772_p1 }
  0x2b   :  { %782 = shalt.err (!%p779_p5)
}
  0x2c   :  { %53 = dma.hbm_to_vmem [thread:$0]  %s898_s3, 128, %s51_s6, [#allocation8]  }
  0x2d   :  { %783 = dma.done.wait [#allocation3], 128  }
  0x2e   :  { %784 = vsyncadd [#allocation3], 4294967168 }
  0x2f   :  { %785 = dma.done.wait [#allocation5], 2432  }
  0x30   :  { %786 = vsyncadd [#allocation5], 4294964864 }
  0x31   :  { %787 = dma.done.wait [#allocation8], 128  }
  0x32   :  { %788 = vsyncadd [#allocation8], 4294967168  ;;  %v795_v0 = vmov 0.0   ;;  %vm796_vm0 = vmmov 0   ;;  %vm111_vm1 = vcmask 1042432   ;;  %v68_v2 = vld [vmem:[#allocation4] sm:$0xff]  ;;  %v234_v50 = vlaneseq }
  0x33   :  { %616 = vmatprep.subr.bf16.mxu1 %v795_v0  ;;  %618 = vmatprep.mubr.msk.bf16.mxu1 %vm796_vm0, %v795_v0  ;;  %v71_v1 = vld [vmem:[#allocation6 + $0x8] sm:$0x7]  ;;  %v106_v4 = vpack.c.bf16 %v68_v2, %v68_v2  ;;  %vm107_vm2 = vcmask 48128   ;;  %v680_v5 = vld [vmem:[#allocation6] sm:$0xff]   ;;  %vm161_vm3 = vcmask 130048   ;;  %v67_v6 = vld [vmem:[#allocation2] sm:$0xff] }
  0x34   :  { %628 = vmatprep.subr.bf16.mxu0 %v795_v0  ;;  %640 = vmatprep.mubr.msk.bf16.mxu0 %vm796_vm0, %v795_v0  ;;  %v113_v3 = vsel %vm111_vm1, %v71_v1, 0  ;;  %v105_v7 = vpack.c.bf16 %v67_v6, %v67_v6  ;;  %v681_v8 = vld [vmem:[#allocation6 + $0x38] sm:$0xff]   ;;  %v682_v9 = vld [vmem:[#allocation6 + $0x88] sm:$0xff]   ;;  %v683_v10 = vld [vmem:[#allocation6 + $0x30] sm:$0xff]   ;;  %vm205_vm4 = vcmask 785408   ;;  %v859_v51 = vshrl.u32 %v234_v50, 7 }
  0x35   :  { %617 = vmatpush3.bf16.msra.mxu1 %v113_v3  ;;  %629 = vmatpush3.bf16.msra.mxu0 %v681_v8  ;;  %v684_v11 = vld [vmem:[#allocation6 + $0x80] sm:$0xff]   ;;  %v685_v12 = vld [vmem:[#allocation6 + $0x28] sm:$0xff]   ;;  %v686_v13 = vld [vmem:[#allocation6 + $0x78] sm:$0xff]   ;;  %vm325_vm5 = vcmask 523264   ;;  %vm509_vm6 = vcmask 261120   ;;  %vm562_vm7 = vcmask 7168  }
  0x36   :  { %622 = vmatprep.subr.bf16.mxu1 %v795_v0  ;;  %630 = vmatprep.subr.bf16.mxu0 %v795_v0  ;;  %v687_v14 = vld [vmem:[#allocation6 + $0x20] sm:$0xff]   ;;  %v688_v15 = vld [vmem:[#allocation6 + $0x70] sm:$0xff]   ;;  %v689_v16 = vld [vmem:[#allocation6 + $0x18] sm:$0xff]   ;;  %v236_v55 = vsub.s32 0, %v859_v51  ;;  %v241_v59 = vsub.s32 1, %v859_v51 }
  0x37   :  { %v690_v17 = vld [vmem:[#allocation6 + $0x68] sm:$0xff]   ;;  %v691_v18 = vld [vmem:[#allocation6 + $0x10] sm:$0xff]   ;;  %v692_v19 = vld [vmem:[#allocation6 + $0x60] sm:$0xff]  }
  0x38   :  { %619 = vmatmul.mubr.msk.bf16.vlgmr.msra.gmra.mxu1 %vm107_vm2, %v106_v4  ;;  %v861_v52 = vld [vmem:[#allocation7] sm:$0xff]  ;;  %v693_v3 = vld [vmem:[#allocation6 + $0x58] sm:$0xff]   ;;  %v696_v6 = vld [vmem:[#allocation6 + $0x40] sm:$0xff]  }
  0x39   :  { %623 = vmatpush3.bf16.msra.mxu1 %v680_v5  ;;  %624 = vmatprep.mubr.msk.bf16.mxu1 %vm796_vm0, %v795_v0  ;;  %v694_v4 = vld [vmem:[#allocation6 + $0x50] sm:$0xff]   ;;  %v695_v5 = vld [vmem:[#allocation6 + $0x48] sm:$0xff]  }
  0x3a   :  { %644 = vmatprep.subr.bf16.mxu1 %v795_v0  ;;  %631 = vmatpush3.bf16.msra.mxu0 %v683_v10 }
  0x3b   :  { %632 = vmatprep.subr.bf16.mxu0 %v795_v0 }
  0x3e   :  { %633 = vmatpush3.bf16.msra.mxu0 %v685_v12 }
  0x3f   :  { %634 = vmatprep.subr.bf16.mxu0 %v795_v0 }
  0x40   :  { %625 = vmatmul.mubr.msk.bf16.vlgmr.msra.gmra.mxu1 %vm161_vm3, %v105_v7 }
  0x41   :  { %656 = vmatprep.mubr.msk.bf16.mxu1 %vm796_vm0, %v795_v0  ;;  %645 = vmatpush3.bf16.msra.mxu1 %v682_v9 }
  0x42   :  { %646 = vmatprep.subr.bf16.mxu1 %v795_v0  ;;  %635 = vmatpush3.bf16.msra.mxu0 %v687_v14 }
  0x43   :  { %636 = vmatprep.subr.bf16.mxu0 %v795_v0 }
  0x45   :  { %647 = vmatpush3.bf16.msra.mxu1 %v684_v11 }
  0x46   :  { %648 = vmatprep.subr.bf16.mxu1 %v795_v0  ;;  %637 = vmatpush3.bf16.msra.mxu0 %v689_v16 }
  0x47   :  { %638 = vmatprep.subr.bf16.mxu0 %v795_v0 }
  0x49   :  { %649 = vmatpush3.bf16.msra.mxu1 %v686_v13 }
  0x4a   :  { %650 = vmatprep.subr.bf16.mxu1 %v795_v0  ;;  %639 = vmatpush3.bf16.msra.mxu0 %v691_v18 }
  0x4b   :  { %660 = vmatprep.subr.bf16.mxu0 %v795_v0 }
  0x4d   :  { %651 = vmatpush3.bf16.msra.mxu1 %v688_v15 }
  0x4e   :  { %652 = vmatprep.subr.bf16.mxu1 %v795_v0 }
  0x51   :  { %653 = vmatpush3.bf16.msra.mxu1 %v690_v17 }
  0x52   :  { %654 = vmatprep.subr.bf16.mxu1 %v795_v0 }
  0x55   :  { %655 = vmatpush3.bf16.msra.mxu1 %v692_v19 }
  0xf8   :  { %v149_v20 = vpop.f32.mrf.mxu1 }
  0xfa   :  { %v620_v21 = vpop.f32.mrf.mxu1 }
  0xfc   :  { %v152_v22 = vpop.f32.mrf.mxu1 }
  0xfe   :  { %v621_v23 = vpop.f32.mrf.mxu1 }
 0x100   :  { %v199_v24 = vpop.f32.mrf.mxu1 }
 0x101   :  { %v200_v25 = vadd.f32 %v199_v24, %v149_v20 }
 0x102   :  { %v626_v26 = vpop.f32.mrf.mxu1 }
 0x103   :  { %v214_v27 = vmul.f32 %v200_v25, %v200_v25  ;;  %v206_v28 = vsel %vm205_vm4, %v200_v25, 0.0 }
 0x104   :  { %v202_v29 = vpop.f32.mrf.mxu1  ;;  %v207_v30 = vrot.slane %v206_v28, 4 }
 0x105   :  { %v215_v31 = vsel %vm205_vm4, %v214_v27, 0.0 }
 0x106   :  { %v627_v32 = vpop.f32.mrf.mxu1  ;;  %v208_v33 = vadd.f32 %v207_v30, %v206_v28  ;;  %v216_v34 = vrot.slane %v215_v31, 4 }
 0x108   :  { %v209_v35 = vrot.slane %v208_v33, 2  ;;  %v217_v36 = vadd.f32 %v216_v34, %v215_v31 }
 0x10a   :  { %v210_v37 = vadd.f32 %v209_v35, %v208_v33  ;;  %v218_v38 = vrot.slane %v217_v36, 2 }
 0x10c   :  { %v211_v39 = vrot.slane %v210_v37, 1  ;;  %v219_v40 = vadd.f32 %v218_v38, %v217_v36 }
 0x10e   :  { %v212_v41 = vadd.f32 %v211_v39, %v210_v37  ;;  %v220_v42 = vrot.slane %v219_v40, 1  ;;  %v356_v37 = vsub.s32 2, %v859_v51 }
 0x110   :  { %v213_v43 = vmul.f32 0.125, %v212_v41  ;;  %v221_v44 = vadd.f32 %v220_v42, %v219_v40  ;;  %v361_v41 = vsub.s32 3, %v859_v51 }
 0x112   :  { %v222_v45 = vmul.f32 0.125, %v221_v44  ;;  %v223_v46 = vmul.f32 %v213_v43, %v213_v43 }
 0x114   :  { %v224_v47 = vsub.f32 %v222_v45, %v223_v46 }
 0x116   :  { %v225_v48 = vmax.f32 %v224_v47, 0.0 }
 0x118   :  { %v226_v49 = vadd.f32 1e-05, %v225_v48 }
 0x11a   :  { %697 = vrsqrt.f32 %v226_v49 }
 0x127   :  { %v698_v53 = vpop.eup %697 }
 0x128   :  { %v228_v54 = vmul.f32 %v698_v53, %v861_v52 }
 0x12a   :  { %v229_v56 = vmul.f32 %v228_v54, %v213_v43  ;;  %v237_v58 = vrot.slane %v228_v54, %v236_v55 }
 0x12c   :  { %v231_v57 = vrot.slane %v229_v56, 7  ;;  %v238_v61 = vmul.f32 %v237_v58, %v200_v25 }
 0x12e   :  { %v233_v60 = vsub.f32 %v861_v52, %v231_v57 }
 0x130   :  { %v242_v62 = vrot.slane %v233_v60, %v241_v59 }
 0x132   :  { %v243_v63 = vadd.f32 %v242_v62, %v238_v61 }
 0x134   :  { %v244_v1 = vmax.f32 %v243_v63, 0.0 }
 0x136   :  { %v245_v2 = vpack.c.bf16 %v244_v1, %v244_v1 }
 0x138   :  { %641 = vmatmul.mubr.msk.bf16.vlgmr.msra.gmra.mxu0 %vm205_vm4, %v245_v2  ;;  %657 = vmatmul.mubr.msk.bf16.vlgmr.msra.gmra.mxu1 %vm205_vm4, %v245_v2 }
 0x139   :  { %668 = vmatprep.mubr.msk.bf16.mxu0 %vm796_vm0, %v795_v0  ;;  %661 = vmatpush3.bf16.msra.mxu0 %v693_v3 }
 0x13a   :  { %662 = vmatprep.subr.bf16.mxu0 %v795_v0 }
 0x13d   :  { %663 = vmatpush3.bf16.msra.mxu0 %v694_v4 }
 0x13e   :  { %664 = vmatprep.subr.bf16.mxu0 %v795_v0 }
 0x141   :  { %665 = vmatpush3.bf16.msra.mxu0 %v695_v5 }
 0x142   :  { %666 = vmatprep.subr.bf16.mxu0 %v795_v0 }
 0x145   :  { %667 = vmatpush3.bf16.msra.mxu0 %v696_v6 }
 0x1f8   :  { %v319_v7 = vpop.f32.mrf.mxu0  ;;  %v436_v8 = vpop.f32.mrf.mxu1 }
 0x1f9   :  { %v326_v9 = vsel %vm325_vm5, %v319_v7, 0.0  ;;  %v334_v10 = vmul.f32 %v319_v7, %v319_v7 }
 0x1fa   :  { %v327_v11 = vrot.slane %v326_v9, 4  ;;  %v642_v12 = vpop.f32.mrf.mxu0  ;;  %v658_v13 = vpop.f32.mrf.mxu1 }
 0x1fb   :  { %v335_v14 = vsel %vm325_vm5, %v334_v10, 0.0 }
 0x1fc   :  { %v328_v15 = vadd.f32 %v327_v11, %v326_v9  ;;  %v336_v16 = vrot.slane %v335_v14, 4  ;;  %v322_v17 = vpop.f32.mrf.mxu0  ;;  %v439_v18 = vpop.f32.mrf.mxu1 }
 0x1fe   :  { %v329_v19 = vrot.slane %v328_v15, 2  ;;  %v337_v20 = vadd.f32 %v336_v16, %v335_v14  ;;  %v643_v0 = vpop.f32.mrf.mxu0  ;;  %v659_v21 = vpop.f32.mrf.mxu1 }
 0x1ff   :  { %v551_v0 = vsub.s32 6, %v859_v51 }
 0x200   :  { %v330_v22 = vadd.f32 %v329_v19, %v328_v15  ;;  %v338_v23 = vrot.slane %v337_v20, 2  ;;  %v540_v15 = vsub.s32 4, %v859_v51  ;;  %v545_v19 = vsub.s32 5, %v859_v51 }
 0x202   :  { %v331_v24 = vrot.slane %v330_v22, 1  ;;  %v339_v25 = vadd.f32 %v338_v23, %v337_v20 }
 0x204   :  { %v332_v26 = vadd.f32 %v331_v24, %v330_v22  ;;  %v340_v27 = vrot.slane %v339_v25, 1  ;;  %v552_v24 = vrot.slane %v861_v52, %v551_v0 }
 0x206   :  { %v333_v28 = vmul.f32 0.125, %v332_v26  ;;  %v341_v29 = vadd.f32 %v340_v27, %v339_v25 }
 0x208   :  { %v342_v30 = vmul.f32 0.125, %v341_v29  ;;  %v343_v31 = vmul.f32 %v333_v28, %v333_v28 }
 0x20a   :  { %v344_v32 = vsub.f32 %v342_v30, %v343_v31 }
 0x20c   :  { %v345_v33 = vmax.f32 %v344_v32, 0.0 }
 0x20e   :  { %v346_v34 = vadd.f32 1e-05, %v345_v33 }
 0x210   :  { %699 = vrsqrt.f32 %v346_v34 }
 0x21d   :  { %v700_v35 = vpop.eup %699 }
 0x21e   :  { %v348_v36 = vmul.f32 %v700_v35, %v861_v52 }
 0x220   :  { %v349_v38 = vmul.f32 %v348_v36, %v333_v28  ;;  %v357_v40 = vrot.slane %v348_v36, %v356_v37  ;;  %v559_v28 = vsub.s32 7, %v859_v51 }
 0x222   :  { %v351_v39 = vrot.slane %v349_v38, 7  ;;  %v358_v43 = vmul.f32 %v357_v40, %v319_v7  ;;  %v560_v29 = vrot.slane %v861_v52, %v559_v28 }
 0x224   :  { %v353_v42 = vsub.f32 %v861_v52, %v351_v39 }
 0x226   :  { %v362_v44 = vrot.slane %v353_v42, %v361_v41 }
 0x228   :  { %v363_v45 = vadd.f32 %v362_v44, %v358_v43 }
 0x22a   :  { %v364_v46 = vmax.f32 %v363_v45, 0.0 }
 0x22c   :  { %v365_v47 = vpack.c.bf16 %v364_v46, %v364_v46 }
 0x22e   :  { %669 = vmatmul.mubr.msk.bf16.vlgmr.msra.gmra.mxu0 %vm325_vm5, %v365_v47 }
 0x2ee   :  { %v503_v48 = vpop.f32.mrf.mxu0 }
 0x2ef   :  { %v504_v49 = vadd.f32 %v503_v48, %v436_v8 }
 0x2f0   :  { %v670_v50 = vpop.f32.mrf.mxu0 }
 0x2f1   :  { %v518_v53 = vmul.f32 %v504_v49, %v504_v49  ;;  %v510_v54 = vsel %vm509_vm6, %v504_v49, 0.0 }
 0x2f2   :  { %v506_v55 = vpop.f32.mrf.mxu0  ;;  %v511_v56 = vrot.slane %v510_v54, 4 }
 0x2f3   :  { %v519_v57 = vsel %vm509_vm6, %v518_v53, 0.0 }
 0x2f4   :  { %v671_v58 = vpop.f32.mrf.mxu0  ;;  %v512_v59 = vadd.f32 %v511_v56, %v510_v54  ;;  %v520_v60 = vrot.slane %v519_v57, 4 }
 0x2f6   :  { %v513_v61 = vrot.slane %v512_v59, 2  ;;  %v521_v62 = vadd.f32 %v520_v60, %v519_v57 }
 0x2f8   :  { %v514_v63 = vadd.f32 %v513_v61, %v512_v59  ;;  %v522_v1 = vrot.slane %v521_v62, 2 }
 0x2fa   :  { %v515_v2 = vrot.slane %v514_v63, 1  ;;  %v523_v3 = vadd.f32 %v522_v1, %v521_v62 }
 0x2fc   :  { %v516_v4 = vadd.f32 %v515_v2, %v514_v63  ;;  %v524_v5 = vrot.slane %v523_v3, 1 }
 0x2fe   :  { %v517_v6 = vmul.f32 0.125, %v516_v4  ;;  %v525_v7 = vadd.f32 %v524_v5, %v523_v3 }
 0x300   :  { %v526_v8 = vmul.f32 0.125, %v525_v7  ;;  %v527_v9 = vmul.f32 %v517_v6, %v517_v6 }
 0x302   :  { %v528_v10 = vsub.f32 %v526_v8, %v527_v9 }
 0x304   :  { %v529_v11 = vmax.f32 %v528_v10, 0.0 }
 0x306   :  { %v530_v12 = vadd.f32 1e-05, %v529_v11 }
 0x308   :  { %701 = vrsqrt.f32 %v530_v12 }
 0x315   :  { %v702_v13 = vpop.eup %701 }
 0x316   :  { %v532_v14 = vmul.f32 %v702_v13, %v861_v52 }
 0x318   :  { %v533_v16 = vmul.f32 %v532_v14, %v517_v6  ;;  %v541_v18 = vrot.slane %v532_v14, %v540_v15 }
 0x31a   :  { %v535_v17 = vrot.slane %v533_v16, 7  ;;  %v542_v21 = vmul.f32 %v541_v18, %v504_v49 }
 0x31c   :  { %v537_v20 = vsub.f32 %v861_v52, %v535_v17 }
 0x31e   :  { %v546_v22 = vrot.slane %v537_v20, %v545_v19 }
 0x320   :  { %v547_v23 = vadd.f32 %v546_v22, %v542_v21 }
 0x322   :  { %v548_v25 = vmax.f32 %v547_v23, 0.0 }
 0x324   :  { %v553_v26 = vmul.f32 %v552_v24, %v548_v25 }
 0x326   :  { %v554_v27 = vsel %vm509_vm6, %v553_v26, 0.0 }
 0x327   :  { %555 = vadd.xlane.f32.xlu0 %v554_v27 }
 0x3b0   :  { %v556_v30 = vpop.xlane.xlu0 %555 }
 0x3b1   :  { %v561_v31 = vadd.f32 %v560_v29, %v556_v30 }
 0x3b3   :  { %563 = vst.msk [vmem:[%s899_s4] sm:$0xff] %vm562_vm7, %v561_v31 }
 0x3b4   :  { %568 = vsyncpa [#allocation3], 1 }
 0x3b5   :  { %569 = vsyncpa [#allocation5], 1 }
 0x3b6   :  { %570 = vsyncpa [#allocation8], 1 }

</bundles_post_ra>
